<compile_context>
chip_gen: v5e
topology: v5e:2x2
jax: 0.10.0
libtpu: 0.0.40
codegen_flags: <defaults>
</compile_context>

<pallas_src>
import functools

import jax
import jax.numpy as jnp
from jax import lax
from jax.experimental import pallas as pl
from jax.experimental.pallas import tpu as pltpu


def _linear_stats_kernel(x_ref, w_ref, y_ref, stats_ref):
    """y = x @ W (stored bf16); per-tile partial sum / sum-of-squares of y (f32)."""
    y = jnp.dot(x_ref[...], w_ref[...], preferred_element_type=jnp.float32)
    y_ref[...] = y.astype(y_ref.dtype)
    s = jnp.sum(y, axis=0, keepdims=True)
    sq = jnp.sum(y * y, axis=0, keepdims=True)
    stats_ref[...] = jnp.concatenate([s, sq], axis=0)[None]          # (1, 2, c_out)


def _bn_relu_segmax_kernel(inv_ref, y_ref, scale_ref, shift_ref, xmax_ref, *, tile_p):
    """x = relu(y*scale+shift) on the fly; running segment-max into resident x_max."""
    @pl.when(pl.program_id(0) == 0)
    def _():
        # x is post-ReLU (>=0) and every pillar is occupied, so 0-init == scatter_max.
        xmax_ref[...] = jnp.zeros_like(xmax_ref)

    x = jnp.maximum(y_ref[...].astype(jnp.float32) * scale_ref[...] + shift_ref[...], 0.0)
    inv = inv_ref[...]                                               # (tile_n, 1) int32
    num_p = xmax_ref.shape[0]

    @pl.loop(0, num_p // tile_p)
    def _(pt):
        base = pl.multiple_of(pt * tile_p, tile_p)
        rows = []
        for r in range(tile_p):                                      # unrolled: 2-D masked maxes only
            m = inv == (base + r)                                    # (tile_n, 1)
            rows.append(jnp.max(jnp.where(m, x, 0.0), axis=0, keepdims=True))
        upd = jnp.concatenate(rows, axis=0)                          # (tile_p, c_out)
        cur = xmax_ref[pl.ds(base, tile_p), :]
        xmax_ref[pl.ds(base, tile_p), :] = jnp.maximum(cur, upd)


def _bn_relu_gather_concat_kernel(inv_ref, y_ref, scale_ref, shift_ref, xmax_ref,
                                  out_ref, *, tile_pp):
    """out = concat([relu(y*scale+shift), x_max[unq_inv]]); gather = tiled one-hot matmul."""
    x = jnp.maximum(y_ref[...].astype(jnp.float32) * scale_ref[...] + shift_ref[...], 0.0)
    tn, c_out = y_ref.shape
    num_p = xmax_ref.shape[0]
    inv = inv_ref[...]                                               # (tile_n, 1)
    lane_pid = jax.lax.broadcasted_iota(jnp.int32, (tn, tile_pp), 1)

    def body(pt, acc):
        base = pl.multiple_of(pt * tile_pp, tile_pp)
        onehot = (inv == (lane_pid + base)).astype(jnp.float32)      # (tile_n, tile_pp)
        xm = xmax_ref[pl.ds(base, tile_pp), :]                       # (tile_pp, c_out)
        # exactly one 1 per row across all pillar tiles -> sum == gather
        return acc + jnp.dot(onehot, xm, preferred_element_type=jnp.float32)

    gathered = lax.fori_loop(0, num_p // tile_pp, body,
                             jnp.zeros((tn, c_out), jnp.float32))
    out_ref[...] = jnp.concatenate([x, gathered], axis=1).astype(out_ref.dtype)


def pfn_layer_v2(inputs, unq_inv, params, *, num_pillars, last_vfe=False,
                 use_norm=True, eps=1e-3, tile_n=512, tile_p=8, tile_pp=256,
                 vmem_limit_bytes=None):
    n, c_in = inputs.shape
    w = params["weight"].astype(jnp.float32)                         # (C_in, C_out_eff)
    c_out = w.shape[1]

    tile_n = min(tile_n, n)
    tile_p = min(tile_p, num_pillars)
    tile_pp = min(tile_pp, num_pillars)
    assert n % tile_n == 0, "N must be a multiple of tile_n"
    assert num_pillars % tile_p == 0 and num_pillars % tile_pp == 0
    n_tiles = n // tile_n
    # TODO(synk): unq_inv as (N,1) int32 pads to 128 lanes in VMEM; a lane-dense or
    # SMEM-prefetched layout would shave a small per-step DMA.
    inv2d = unq_inv.astype(jnp.int32).reshape(n, 1)

    def cparams(sem):
        kw = dict(dimension_semantics=sem)
        if vmem_limit_bytes is not None:  # re-budget explicitly on v7x (64 MiB VMEM)
            kw["vmem_limit_bytes"] = vmem_limit_bytes
        return pltpu.CompilerParams(**kw)

    # ---- 1) linear (no bias) + per-tile partial batch statistics (parallel grid) ----
    y, part = pl.pallas_call(
        _linear_stats_kernel,
        out_shape=(jax.ShapeDtypeStruct((n, c_out), jnp.bfloat16),
                   jax.ShapeDtypeStruct((n_tiles, 2, c_out), jnp.float32)),
        grid=(n_tiles,),
        in_specs=[pl.BlockSpec((tile_n, c_in), lambda i: (i, 0)),
                  pl.BlockSpec((c_in, c_out), lambda i: (0, 0))],
        out_specs=(pl.BlockSpec((tile_n, c_out), lambda i: (i, 0)),
                   pl.BlockSpec((1, 2, c_out), lambda i: (i, 0, 0))),
        compiler_params=cparams(("parallel",)),
    )(inputs.astype(jnp.float32), w)

    stats = jnp.sum(part, axis=0)                                    # (2, c_out)
    if use_norm:
        mean = stats[0] / n
        var = stats[1] / n - mean * mean                             # biased var (BatchNorm)
        scale = params["gamma"] * lax.rsqrt(var + eps)
        shift = params["beta"] - mean * scale
    else:
        scale = jnp.ones((c_out,), jnp.float32)
        shift = params["bias"].astype(jnp.float32)
    scale = scale.reshape(1, c_out).astype(jnp.float32)
    shift = shift.reshape(1, c_out).astype(jnp.float32)

    # ---- 2) fused BN-affine + ReLU + scatter_max (single pass, resident x_max) ------
    x_max = pl.pallas_call(
        functools.partial(_bn_relu_segmax_kernel, tile_p=tile_p),
        out_shape=jax.ShapeDtypeStruct((num_pillars, c_out), jnp.float32),
        grid=(n_tiles,),
        in_specs=[pl.BlockSpec((tile_n, 1), lambda i: (i, 0)),
                  pl.BlockSpec((tile_n, c_out), lambda i: (i, 0)),
                  pl.BlockSpec((1, c_out), lambda i: (0, 0)),
                  pl.BlockSpec((1, c_out), lambda i: (0, 0))],
        out_specs=pl.BlockSpec((num_pillars, c_out), lambda i: (0, 0)),
        compiler_params=cparams(("arbitrary",)),
    )(inv2d, y, scale, shift)

    if last_vfe:
        return x_max

    # ---- 3) fused BN-affine + ReLU + gather(x_max[unq_inv]) + concat ----------------
    out = pl.pallas_call(
        functools.partial(_bn_relu_gather_concat_kernel, tile_pp=tile_pp),
        out_shape=jax.ShapeDtypeStruct((n, 2 * c_out), jnp.float32),
        grid=(n_tiles,),
        in_specs=[pl.BlockSpec((tile_n, 1), lambda i: (i, 0)),
                  pl.BlockSpec((tile_n, c_out), lambda i: (i, 0)),
                  pl.BlockSpec((1, c_out), lambda i: (0, 0)),
                  pl.BlockSpec((1, c_out), lambda i: (0, 0)),
                  pl.BlockSpec((num_pillars, c_out), lambda i: (0, 0))],
        out_specs=pl.BlockSpec((tile_n, 2 * c_out), lambda i: (i, 0)),
        compiler_params=cparams(("parallel",)),
    )(inv2d, y, scale, shift, x_max)
    return out


if __name__ == "__main__":
    key = jax.random.PRNGKey(0)
    N, C_IN, OUT_CHANNELS, P = 1024, 16, 64, 64
    C_OUT = OUT_CHANNELS // 2                 # last_layer=False -> half channels

    k1, k2, k3 = jax.random.split(key, 3)
    inputs = jax.random.normal(k1, (N, C_IN), jnp.float32)
    # every pillar id in [0, P) appears (guaranteed by torch.unique upstream)
    unq_inv = jax.random.permutation(k2, jnp.arange(N) % P).astype(jnp.int32)

    params = {
        "weight": jax.random.normal(k3, (C_IN, C_OUT), jnp.float32) * 0.1,
        "gamma": 1.0 + 0.01 * jnp.arange(C_OUT, dtype=jnp.float32),
        "beta": 0.02 * jnp.arange(C_OUT, dtype=jnp.float32),
    }

    out = pfn_layer_v2(inputs, unq_inv, params, num_pillars=P, last_vfe=False)
    out = jax.block_until_ready(out)

    # pure-JAX f32 reference (training-mode BatchNorm1d semantics)
    y_ref = inputs @ params["weight"]
    mean = y_ref.mean(0)
    var = y_ref.var(0)
    x_ref = jnp.maximum(
        (y_ref - mean) * params["gamma"] / jnp.sqrt(var + 1e-3) + params["beta"], 0.0)
    xmax_ref = jax.ops.segment_max(x_ref, unq_inv, num_segments=P)
    ref = jnp.concatenate([x_ref, xmax_ref[unq_inv]], axis=1)

    assert out.shape == (N, 2 * C_OUT)
    # y is stored in bf16 -> small quantization error vs the all-f32 reference
    err = float(jnp.max(jnp.abs(out - ref)))
    assert err < 5e-2, err

    # also exercise the last_vfe path (returns per-pillar max)
    xm = jax.block_until_ready(
        pfn_layer_v2(inputs, unq_inv, params, num_pillars=P, last_vfe=True))
    assert xm.shape == (P, C_OUT)
    assert float(jnp.max(jnp.abs(xm - xmax_ref))) < 5e-2

    print("KERNEL_OK")
</pallas_src>

<mosaic_0001>
module attributes {stable_mosaic.version = 11 : i64} {
  func.func @_linear_stats_kernel(%arg0: i32, %arg1: memref<512x16xf32, #tpu.memory_space<vmem>>, %arg2: memref<16x32xf32, #tpu.memory_space<vmem>>, %arg3: memref<512x32xbf16, #tpu.memory_space<vmem>>, %arg4: memref<1x2x32xf32, #tpu.memory_space<vmem>>) attributes {dimension_semantics = [#tpu.dimension_semantics<parallel>], iteration_bounds = array<i64: 2>, scalar_prefetch = 0 : i64, scratch_operands = 0 : i64, tpu.core_type = #tpu.core_type<tc>, window_params = [{transform_indices = @transform_0, window_bounds = array<i64: 512, 16>}, {pipeline_mode = #tpu.pipeline_mode<synchronous>, transform_indices = @transform_1, window_bounds = array<i64: 16, 32>}, {transform_indices = @transform_2, window_bounds = array<i64: 512, 32>}, {transform_indices = @transform_3, window_bounds = array<i64: 1, 2, 32>}]} {
    %c0 = arith.constant 0 : index
    %c0_0 = arith.constant 0 : index
    %0 = vector.load %arg1[%c0, %c0_0] : memref<512x16xf32, #tpu.memory_space<vmem>>, vector<512x16xf32>
    %c0_1 = arith.constant 0 : index
    %c0_2 = arith.constant 0 : index
    %1 = vector.load %arg2[%c0_1, %c0_2] : memref<16x32xf32, #tpu.memory_space<vmem>>, vector<16x32xf32>
    %cst = arith.constant dense<0.000000e+00> : vector<512x32xf32>
    %2 = tpu.matmul %0, %1, %cst {dimension_numbers = #tpu.dot_dimension_numbers<[1], [0], [0], [1], [0, 0, 1, 1], [], []>} : vector<512x16xf32>, vector<16x32xf32>, vector<512x32xf32> -> vector<512x32xf32>
    %3 = arith.truncf %2 : vector<512x32xf32> to vector<512x32xbf16>
    %c0_3 = arith.constant 0 : index
    %c0_4 = arith.constant 0 : index
    %4 = vector.load %arg3[%c0_3, %c0_4] : memref<512x32xbf16, #tpu.memory_space<vmem>>, vector<512x32xbf16>
    tpu.vector_store %arg3[%c0_3, %c0_4], %3 {strides = array<i32>} : memref<512x32xbf16, #tpu.memory_space<vmem>>, vector<512x32xbf16>,
    %cst_5 = arith.constant dense<0.000000e+00> : vector<32xf32>
    %5 = vector.multi_reduction <add>, %2, %cst_5 [0] : vector<512x32xf32> to vector<32xf32>
    %6 = vector.shape_cast %5 : vector<32xf32> to vector<1x32xf32>
    %7 = arith.mulf %2, %2 : vector<512x32xf32>
    %cst_6 = arith.constant dense<0.000000e+00> : vector<32xf32>
    %8 = vector.multi_reduction <add>, %7, %cst_6 [0] : vector<512x32xf32> to vector<32xf32>
    %9 = vector.shape_cast %8 : vector<32xf32> to vector<1x32xf32>
    %10 = tpu.concatenate %6, %9 in 0 : vector<1x32xf32>, vector<1x32xf32> -> vector<2x32xf32>
    %11 = vector.shape_cast %10 : vector<2x32xf32> to vector<1x2x32xf32>
    %c0_7 = arith.constant 0 : index
    %c0_8 = arith.constant 0 : index
    %c0_9 = arith.constant 0 : index
    %12 = vector.load %arg4[%c0_7, %c0_8, %c0_9] : memref<1x2x32xf32, #tpu.memory_space<vmem>>, vector<1x2x32xf32>
    tpu.vector_store %arg4[%c0_7, %c0_8, %c0_9], %11 {strides = array<i32>} : memref<1x2x32xf32, #tpu.memory_space<vmem>>, vector<1x2x32xf32>,
    return
  }
  func.func @transform_0(%arg0: i32) -> (i32, i32) {
    %c0_i32 = arith.constant 0 : i32
    %c0_i32_0 = arith.constant 0 : i32
    return %arg0, %c0_i32 : i32, i32
  }
  func.func @transform_1(%arg0: i32) -> (i32, i32) {
    %c0_i32 = arith.constant 0 : i32
    %c0_i32_0 = arith.constant 0 : i32
    %c0_i32_1 = arith.constant 0 : i32
    return %c0_i32, %c0_i32_0 : i32, i32
  }
  func.func @transform_2(%arg0: i32) -> (i32, i32) {
    %c0_i32 = arith.constant 0 : i32
    %c0_i32_0 = arith.constant 0 : i32
    return %arg0, %c0_i32 : i32, i32
  }
  func.func @transform_3(%arg0: i32) -> (i32, i32, i32) {
    %c0_i32 = arith.constant 0 : i32
    %c0_i32_0 = arith.constant 0 : i32
    %c0_i32_1 = arith.constant 0 : i32
    return %arg0, %c0_i32, %c0_i32_0 : i32, i32, i32
  }
}

</mosaic_0001>

<bundles_post_ra>
// kernel: tpu_custom_call.1
= control target key start
LH: loop header
LB: loop body
LE: loop exit
PB: predicated region body
PF: predicated region fallthrough
CT: control target
= control target key end

     0   :  { %9 = vsyncpa [#allocation3], 0  ;;  %s2308_s0 = inlined_call_operand.vmem [shape: f32[1024,16], index: 0, kind: input, shape index: {}]   ;;  %s2309_s1 = inlined_call_operand.vmem [shape: f32[16,32], index: 1, kind: input, shape index: {}]   ;;  %s2310_s2 = inlined_call_operand.vmem [shape: bf16[1024,32], index: 2, kind: output, shape index: {0}]   ;;  %s2311_s3 = inlined_call_operand.hbm [shape: f32[2,2,32], index: 3, kind: output, shape index: {1}]  }
   0x1   :  { %11 = vsyncpa [#allocation3 + $0x1], 0  ;;  %s1432_s12 = smov 0   ;;  %s1434_s13 = smov 0  }
   0x2   :  { %s1436_s14 = smov 0   ;;  %s1438_s15 = smov 0  }
   0x3 LB: > { %s1453_s16 = sadd.s32 4294967295, %s1410_s15   ;;  %s1226_s17 = sadd.s32 4294967294, %s1410_s15   ;;  %s1410_s15 = sphi %s1438_s15, %s2317_s15   ;;  %s1406_s14 = sphi %s1436_s14, %s2316_s14   ;;  %s1402_s13 = sphi %s1434_s13, %s2315_s13   ;;  %s1398_s12 = sphi %s1432_s12, %s2314_s12  }
   0x4   : > { %s1457_s18 = sadd.s32 1, %s1410_s15   ;;  %s97_s19 = sadd.s32 1, %s1406_s14 }
   0x5   : > { %s94_s20 = ssub.s32 %s1410_s15, %s1457_s18  ;;  %p107_p0 = scmp.ne.s32.totalorder %s1406_s14, %s1402_s13 }
   0x6   : > { %p95_p1 = scmp.eq.s32.totalorder %s94_s20, 0  ;;  %p108_p2 = scmp.eq.s32.totalorder %s1453_s16, 1 }
   0x7   : > { %p113_p3 = scmp.ne.s32.totalorder %s1402_s13, %s1398_s12  ;;  %p114_p4 = scmp.eq.s32.totalorder %s1226_s17, 1 }
   0x8   : > { %s1468_s21 = scalar_select %p95_p1, %s1406_s14, %s97_s19  }
   0x9   : > { %p1470_p5 = por %p108_p2, %p107_p0  ;;  %p1474_p6 = por %p114_p4, %p113_p3 }
   0xa   : > { %p1229_p7 = scmp.ge.s32.totalorder %s1410_s15, 1  ;;  %p144_p8 = scmp.lt.s32.totalorder %s1410_s15, 3 }
   0xc   : > { %p145_p9 = pnand %p1229_p7, %p144_p8 }
   0xd   : > { %s1231_s28 = sshll.u32 (!%p145_p9), %s1453_s16, 6  ;;  %s170_s10 = sand.u32 (!%p145_p9), 1, %s1402_s13  }
   0xe   : > { %148 = sbr.rel (%p145_p9) target bundleno = 387 (0x183), region = 28  ;;  %p174_p10 = scmp.lt.s32.totalorder (!%p145_p9), %s1231_s28, 127 }
   0xf   : > { %s1230_s11 = sshll.u32 (!%p145_p9), %s170_s10, 1  ;;  %s1300_s17 = sshll.u32 (!%p145_p9), %s1453_s16, 1 }
  0x10   : > { %s1137_s24 = scalar_lea.hbm (!%p145_p9), %s2311_s3, %s1300_s17  ;;  %s172_s25 = scalar_lea.vmem (!%p145_p9), [#allocation2], %s1230_s11 }
  0x11   : > { %s1139_s26 = sshll.u32 (!%p145_p9), %s172_s25, 4  ;;  %s1141_s27 = sshll.u32 (!%p145_p9), %s1137_s24, 4  ;;  %s1140_s26 = int_to_ptr.vmem [resolvable:$true] %s1139_s26  ;;  %s1142_s27 = int_to_ptr.hbm [resolvable:$true] %s1141_s27 }
  0x12   : > { %s1123_s16 = scalar_lea.sflag (!%p145_p9), [#allocation3], %s170_s10 }
  0x13   : > { %v250_v0 = vld [vmem:[%s2309_s1 + $0x8] sm:$0xff]  ;;  %v249_v1 = vld [vmem:[%s2309_s1] sm:$0xff]  ;;  %s2319_s28 = smov (!%p174_p10, %s1231_s28), 127  ;;  %vm251_vm0 = vcmask 130048   ;;  %vm717_vm1 = vcmask 257024   ;;  %vm782_vm2 = vcmask 261120  }
  0x14   : > { %458 = vmatpush.msra.mxu0 %v250_v0  ;;  %1303 = vmatpush.msra.mxu1 %v250_v0  ;;  %s1232_s29 = sshll.u32 %s2319_s28, 3  ;;  %s1234_s6 = sshll.u32 %s2319_s28, 2  ;;  %vm1113_vm3 = vcmask 1040384   ;;  %vm1115_vm4 = vcmask 254976  }
  0x15   : > { %1304 = vmatpush.msra.mxu2 %v250_v0  ;;  %1305 = vmatpush.msra.mxu3 %v250_v0  ;;  %s1493_s5 = scalar_lea.vmem %s2308_s0, %s1232_s29  ;;  %s1607_s9 = scalar_lea.vmem %s2310_s2, %s1234_s6 }
  0x16   : > { %459 = vmatpush.msra.mxu0 %v249_v1  ;;  %1306 = vmatpush.msra.mxu1 %v249_v1  ;;  %v185_v2 = vld [vmem:[%s1493_s5] sm:$0xff]  ;;  %v186_v4 = vld [vmem:[%s1493_s5 + $0x8] sm:$0xff]  ;;  %v187_v6 = vld [vmem:[%s1493_s5 + $0x10] sm:$0xff]  ;;  %s1362_s28 = sshra.s32 %s1142_s27, 4  ;;  %s1363_s28 = int_to_ptr.hbm [resolvable:$true] %s1362_s28 }
  0x17   : > { %1307 = vmatpush.msra.mxu2 %v249_v1  ;;  %1308 = vmatpush.msra.mxu3 %v249_v1  ;;  %v201_v3 = vld [vmem:[%s1493_s5 + $0x80] sm:$0xff]  ;;  %v202_v5 = vld [vmem:[%s1493_s5 + $0x88] sm:$0xff]  ;;  %v203_v7 = vld [vmem:[%s1493_s5 + $0x90] sm:$0xff]  ;;  %s1364_s29 = scalar_lea.hbm %s1363_s28, 2  ;;  %p1369_p0 = scmp.lt.s32.totalorder %s1363_s28, %s2311_s3 }
  0x18   : > { %1235 = vmatmul.msk.f32.vlgmr.msra.gmra.mxu0 %vm251_vm0, %v185_v2  ;;  %1251 = vmatmul.msk.f32.vlgmr.msra.gmra.mxu1 %vm251_vm0, %v201_v3  ;;  %v188_v8 = vld [vmem:[%s1493_s5 + $0x18] sm:$0xff]  ;;  %v217_v10 = vld [vmem:[%s1493_s5 + $0x100] sm:$0xff]  ;;  %v218_v13 = vld [vmem:[%s1493_s5 + $0x108] sm:$0xff]  ;;  %p1365_p11 = scmp.ne.s32.totalorder %s1363_s28, %s1364_s29 }
  0x19   : > { %v204_v9 = vld [vmem:[%s1493_s5 + $0x98] sm:$0xff]  ;;  %1267 = vmatmul.msk.f32.vlgmr.msra.gmra.mxu2 %vm251_vm0, %v217_v10  ;;  %v189_v11 = vld [vmem:[%s1493_s5 + $0x20] sm:$0xff]  ;;  %v190_v14 = vld [vmem:[%s1493_s5 + $0x28] sm:$0xff] }
  0x1a   : > { %v205_v12 = vld [vmem:[%s1493_s5 + $0xa0] sm:$0xff]  ;;  %v206_v15 = vld [vmem:[%s1493_s5 + $0xa8] sm:$0xff]  ;;  %v219_v16 = vld [vmem:[%s1493_s5 + $0x110] sm:$0xff]  ;;  %p1366_p12 = pnand %p1365_p11, %p1470_p5 }
  0x1b   : > { %v191_v17 = vld [vmem:[%s1493_s5 + $0x30] sm:$0xff]  ;;  %v220_v19 = vld [vmem:[%s1493_s5 + $0x118] sm:$0xff]  ;;  %v221_v22 = vld [vmem:[%s1493_s5 + $0x120] sm:$0xff] }
  0x1c   : > { %v207_v18 = vld [vmem:[%s1493_s5 + $0xb0] sm:$0xff]  ;;  %v192_v20 = vld [vmem:[%s1493_s5 + $0x38] sm:$0xff]  ;;  %v233_v23 = vld [vmem:[%s1493_s5 + $0x180] sm:$0xff]  ;;  %p1367_p13 = pneg %p1366_p12 }
  0x1d   : > { %v208_v21 = vld [vmem:[%s1493_s5 + $0xb8] sm:$0xff]  ;;  %1283 = vmatmul.msk.f32.vlgmr.msra.gmra.mxu3 %vm251_vm0, %v233_v23  ;;  %v193_v24 = vld [vmem:[%s1493_s5 + $0x40] sm:$0xff]  ;;  %v222_v26 = vld [vmem:[%s1493_s5 + $0x128] sm:$0xff] }
  0x1e   : > { %v209_v25 = vld [vmem:[%s1493_s5 + $0xc0] sm:$0xff]  ;;  %v234_v27 = vld [vmem:[%s1493_s5 + $0x188] sm:$0xff]  ;;  %v223_v30 = vld [vmem:[%s1493_s5 + $0x130] sm:$0xff] }
  0x1f   : > { %v194_v28 = vld [vmem:[%s1493_s5 + $0x48] sm:$0xff]  ;;  %v235_v31 = vld [vmem:[%s1493_s5 + $0x190] sm:$0xff]  ;;  %v224_v34 = vld [vmem:[%s1493_s5 + $0x138] sm:$0xff] }
  0x20   : > { %1236 = vmatmul.msk.f32.gmra.mxu0 %vm251_vm0, %v186_v4  ;;  %1252 = vmatmul.msk.f32.gmra.mxu1 %vm251_vm0, %v202_v5  ;;  %v210_v29 = vld [vmem:[%s1493_s5 + $0xc8] sm:$0xff]  ;;  %v195_v32 = vld [vmem:[%s1493_s5 + $0x50] sm:$0xff]  ;;  %v236_v35 = vld [vmem:[%s1493_s5 + $0x198] sm:$0xff] }
  0x21   : > { %1268 = vmatmul.msk.f32.gmra.mxu2 %vm251_vm0, %v218_v13  ;;  %v211_v33 = vld [vmem:[%s1493_s5 + $0xd0] sm:$0xff]  ;;  %v196_v36 = vld [vmem:[%s1493_s5 + $0x58] sm:$0xff]  ;;  %v225_v38 = vld [vmem:[%s1493_s5 + $0x140] sm:$0xff] }
  0x22   : > { %v212_v37 = vld [vmem:[%s1493_s5 + $0xd8] sm:$0xff]  ;;  %v237_v39 = vld [vmem:[%s1493_s5 + $0x1a0] sm:$0xff]  ;;  %v226_v42 = vld [vmem:[%s1493_s5 + $0x148] sm:$0xff] }
  0x23   : > { %v197_v40 = vld [vmem:[%s1493_s5 + $0x60] sm:$0xff]  ;;  %v238_v43 = vld [vmem:[%s1493_s5 + $0x1a8] sm:$0xff]  ;;  %v227_v46 = vld [vmem:[%s1493_s5 + $0x150] sm:$0xff] }
  0x24   : > { %v213_v41 = vld [vmem:[%s1493_s5 + $0xe0] sm:$0xff]  ;;  %v198_v44 = vld [vmem:[%s1493_s5 + $0x68] sm:$0xff]  ;;  %v239_v47 = vld [vmem:[%s1493_s5 + $0x1b0] sm:$0xff] }
  0x25   : > { %1284 = vmatmul.msk.f32.gmra.mxu3 %vm251_vm0, %v234_v27  ;;  %v214_v45 = vld [vmem:[%s1493_s5 + $0xe8] sm:$0xff]  ;;  %v199_v48 = vld [vmem:[%s1493_s5 + $0x70] sm:$0xff]  ;;  %v228_v50 = vld [vmem:[%s1493_s5 + $0x158] sm:$0xff] }
  0x26   : > { %v215_v49 = vld [vmem:[%s1493_s5 + $0xf0] sm:$0xff]  ;;  %v240_v51 = vld [vmem:[%s1493_s5 + $0x1b8] sm:$0xff]  ;;  %v229_v54 = vld [vmem:[%s1493_s5 + $0x160] sm:$0xff] }
  0x27   : > { %v200_v52 = vld [vmem:[%s1493_s5 + $0x78] sm:$0xff]  ;;  %v241_v55 = vld [vmem:[%s1493_s5 + $0x1c0] sm:$0xff]  ;;  %v230_v60 = vld [vmem:[%s1493_s5 + $0x168] sm:$0xff] }
  0x28   : > { %1237 = vmatmul.msk.f32.gmra.mxu0 %vm251_vm0, %v187_v6  ;;  %1253 = vmatmul.msk.f32.gmra.mxu1 %vm251_vm0, %v203_v7  ;;  %v216_v53 = vld [vmem:[%s1493_s5 + $0xf8] sm:$0xff]  ;;  %v242_v61 = vld [vmem:[%s1493_s5 + $0x1c8] sm:$0xff]  ;;  %v231_v10 = vld [vmem:[%s1493_s5 + $0x170] sm:$0xff] }
  0x29   : > { %1269 = vmatmul.msk.f32.gmra.mxu2 %vm251_vm0, %v219_v16 }
  0x2d   : > { %1285 = vmatmul.msk.f32.gmra.mxu3 %vm251_vm0, %v235_v31 }
  0x30   : > { %1238 = vmatmul.msk.f32.gmra.mxu0 %vm251_vm0, %v188_v8  ;;  %1254 = vmatmul.msk.f32.gmra.mxu1 %vm251_vm0, %v204_v9 }
  0x31   : > { %1270 = vmatmul.msk.f32.gmra.mxu2 %vm251_vm0, %v220_v19 }
  0x35   : > { %1286 = vmatmul.msk.f32.gmra.mxu3 %vm251_vm0, %v236_v35 }
  0x38   : > { %1239 = vmatmul.msk.f32.gmra.mxu0 %vm251_vm0, %v189_v11  ;;  %1255 = vmatmul.msk.f32.gmra.mxu1 %vm251_vm0, %v205_v12  ;;  %v243_v11 = vld [vmem:[%s1493_s5 + $0x1d0] sm:$0xff] }
  0x39   : > { %1271 = vmatmul.msk.f32.gmra.mxu2 %vm251_vm0, %v221_v22  ;;  %v244_v22 = vld [vmem:[%s1493_s5 + $0x1d8] sm:$0xff] }
  0x3d   : > { %1287 = vmatmul.msk.f32.gmra.mxu3 %vm251_vm0, %v237_v39 }
  0x40   : > { %1240 = vmatmul.msk.f32.gmra.mxu0 %vm251_vm0, %v190_v14  ;;  %1256 = vmatmul.msk.f32.gmra.mxu1 %vm251_vm0, %v206_v15 }
  0x41   : > { %1272 = vmatmul.msk.f32.gmra.mxu2 %vm251_vm0, %v222_v26 }
  0x45   : > { %1288 = vmatmul.msk.f32.gmra.mxu3 %vm251_vm0, %v238_v43 }
  0x48   : > { %1241 = vmatmul.msk.f32.gmra.mxu0 %vm251_vm0, %v191_v17  ;;  %1257 = vmatmul.msk.f32.gmra.mxu1 %vm251_vm0, %v207_v18 }
  0x49   : > { %1273 = vmatmul.msk.f32.gmra.mxu2 %vm251_vm0, %v223_v30 }
  0x4d   : > { %1289 = vmatmul.msk.f32.gmra.mxu3 %vm251_vm0, %v239_v47 }
  0x50   : > { %1242 = vmatmul.msk.f32.gmra.mxu0 %vm251_vm0, %v192_v20  ;;  %1258 = vmatmul.msk.f32.gmra.mxu1 %vm251_vm0, %v208_v21  ;;  %v232_v21 = vld [vmem:[%s1493_s5 + $0x178] sm:$0xff] }
  0x51   : > { %1274 = vmatmul.msk.f32.gmra.mxu2 %vm251_vm0, %v224_v34 }
  0x55   : > { %1290 = vmatmul.msk.f32.gmra.mxu3 %vm251_vm0, %v240_v51  ;;  %v247_v51 = vld [vmem:[%s1493_s5 + $0x1f0] sm:$0xff] }
  0x58   : > { %1243 = vmatmul.msk.f32.gmra.mxu0 %vm251_vm0, %v193_v24  ;;  %1259 = vmatmul.msk.f32.gmra.mxu1 %vm251_vm0, %v209_v25 }
  0x59   : > { %1275 = vmatmul.msk.f32.gmra.mxu2 %vm251_vm0, %v225_v38 }
  0x5d   : > { %1291 = vmatmul.msk.f32.gmra.mxu3 %vm251_vm0, %v241_v55 }
  0x60   : > { %1244 = vmatmul.msk.f32.gmra.mxu0 %vm251_vm0, %v194_v28  ;;  %1260 = vmatmul.msk.f32.gmra.mxu1 %vm251_vm0, %v210_v29 }
  0x61   : > { %1276 = vmatmul.msk.f32.gmra.mxu2 %vm251_vm0, %v226_v42 }
  0x65   : > { %1292 = vmatmul.msk.f32.gmra.mxu3 %vm251_vm0, %v242_v61 }
  0x68   : > { %1245 = vmatmul.msk.f32.gmra.mxu0 %vm251_vm0, %v195_v32  ;;  %1261 = vmatmul.msk.f32.gmra.mxu1 %vm251_vm0, %v211_v33  ;;  %v245_v32 = vld [vmem:[%s1493_s5 + $0x1e0] sm:$0xff] }
  0x69   : > { %1277 = vmatmul.msk.f32.gmra.mxu2 %vm251_vm0, %v227_v46 }
  0x6d   : > { %1293 = vmatmul.msk.f32.gmra.mxu3 %vm251_vm0, %v243_v11 }
  0x70   : > { %1246 = vmatmul.msk.f32.gmra.mxu0 %vm251_vm0, %v196_v36  ;;  %1262 = vmatmul.msk.f32.gmra.mxu1 %vm251_vm0, %v212_v37 }
  0x71   : > { %1278 = vmatmul.msk.f32.gmra.mxu2 %vm251_vm0, %v228_v50 }
  0x75   : > { %1294 = vmatmul.msk.f32.gmra.mxu3 %vm251_vm0, %v244_v22 }
  0x78   : > { %1247 = vmatmul.msk.f32.gmra.mxu0 %vm251_vm0, %v197_v40  ;;  %1263 = vmatmul.msk.f32.gmra.mxu1 %vm251_vm0, %v213_v41 }
  0x79   : > { %1279 = vmatmul.msk.f32.gmra.mxu2 %vm251_vm0, %v229_v54 }
  0x7d   : > { %1295 = vmatmul.msk.f32.gmra.mxu3 %vm251_vm0, %v245_v32 }
  0x80   : > { %1248 = vmatmul.msk.f32.gmra.mxu0 %vm251_vm0, %v198_v44  ;;  %1264 = vmatmul.msk.f32.gmra.mxu1 %vm251_vm0, %v214_v45  ;;  %v246_v44 = vld [vmem:[%s1493_s5 + $0x1e8] sm:$0xff] }
  0x81   : > { %1280 = vmatmul.msk.f32.gmra.mxu2 %vm251_vm0, %v230_v60 }
  0x85   : > { %1296 = vmatmul.msk.f32.gmra.mxu3 %vm251_vm0, %v246_v44 }
  0x88   : > { %1249 = vmatmul.msk.f32.gmra.mxu0 %vm251_vm0, %v199_v48  ;;  %1265 = vmatmul.msk.f32.gmra.mxu1 %vm251_vm0, %v215_v49 }
  0x89   : > { %1281 = vmatmul.msk.f32.gmra.mxu2 %vm251_vm0, %v231_v10 }
  0x8d   : > { %1297 = vmatmul.msk.f32.gmra.mxu3 %vm251_vm0, %v247_v51 }
  0x90   : > { %1250 = vmatmul.msk.f32.gmra.mxu0 %vm251_vm0, %v200_v52  ;;  %1266 = vmatmul.msk.f32.gmra.mxu1 %vm251_vm0, %v216_v53 }
  0x91   : > { %1282 = vmatmul.msk.f32.gmra.mxu2 %vm251_vm0, %v232_v21 }
  0x95   : > { %v461_v56 = vpop.f32.mrf.mxu0  ;;  %v1609_v58 = vpop.f32.mrf.mxu1 }
  0x96   : > { %v653_v57 = vpack.c.bf16 %v461_v56, %v461_v56  ;;  %v669_v59 = vpack.c.bf16 %v1609_v58, %v1609_v58  ;;  %v916_v62 = vmul.f32 %v461_v56, %v461_v56  ;;  %v783_v0 = vsel %vm782_vm2, %v461_v56, 0.0 }
  0x98   : > { %718 = vst.msk [vmem:[%s1607_s9] sm:$0xf] %vm717_vm1, %v653_v57  ;;  %v980_v7 = vsel %vm782_vm2, %v916_v62, 0.0 }
  0x99   : > { %734 = vst.msk [vmem:[%s1607_s9 + $0x40] sm:$0xf] %vm717_vm1, %v669_v59  ;;  %v248_v59 = vld [vmem:[%s1493_s5 + $0x1f8] sm:$0xff]  ;;  %s1368_s5 = scalar_lea.hbm %s2311_s3, 4 }
  0x9a   : > { %1298 = vmatmul.msk.f32.gmra.mxu3 %vm251_vm0, %v248_v59  ;;  %p1370_p1 = scmp.lt.s32.totalorder %s1368_s5, %s1364_s29 }
  0x9c   : > { %v1663_v34 = vpop.f32.mrf.mxu2  ;;  %p1371_p2 = por %p1370_p1, %p1369_p0 }
  0x9d   : > { %v464_v63 = vpop.f32.mrf.mxu0  ;;  %v1623_v4 = vpop.f32.mrf.mxu1  ;;  %v685_v39 = vpack.c.bf16 %v1663_v34, %v1663_v34 }
  0x9e   : > { %v654_v1 = vpack.c.bf16 %v464_v63, %v464_v63  ;;  %v784_v2 = vsel %vm782_vm2, %v464_v63, 0.0  ;;  %v917_v3 = vmul.f32 %v464_v63, %v464_v63  ;;  %v670_v6 = vpack.c.bf16 %v1623_v4, %v1623_v4  ;;  %p1372_p3 = pnand %p1371_p2, %p1367_p13 }
  0x9f   : > { %v785_v5 = vadd.f32 %v784_v2, %v783_v0  ;;  %750 = vst.msk [vmem:[%s1607_s9 + $0x80] sm:$0xf] %vm717_vm1, %v685_v39 }
  0xa0   : > { %719 = vst.msk [vmem:[%s1607_s9 + $0x4] sm:$0xf] %vm717_vm1, %v654_v1  ;;  %v981_v8 = vsel %vm782_vm2, %v917_v3, 0.0 }
  0xa1   : > { %v982_v9 = vadd.f32 %v981_v8, %v980_v7  ;;  %735 = vst.msk [vmem:[%s1607_s9 + $0x44] sm:$0xf] %vm717_vm1, %v670_v6  ;;  %v1753_v8 = vpop.f32.mrf.mxu3 }
  0xa2   : > { %v701_v10 = vpack.c.bf16 %v1753_v8, %v1753_v8 }
  0xa4   : > { %v1687_v46 = vpop.f32.mrf.mxu2  ;;  %766 = vst.msk [vmem:[%s1607_s9 + $0xc0] sm:$0xf] %vm717_vm1, %v701_v10 }
  0xa5   : > { %v467_v12 = vpop.f32.mrf.mxu0  ;;  %v1638_v16 = vpop.f32.mrf.mxu1  ;;  %v686_v49 = vpack.c.bf16 %v1687_v46, %v1687_v46 }
  0xa6   : > { %v655_v13 = vpack.c.bf16 %v467_v12, %v467_v12  ;;  %v786_v14 = vsel %vm782_vm2, %v467_v12, 0.0  ;;  %v918_v15 = vmul.f32 %v467_v12, %v467_v12  ;;  %v671_v18 = vpack.c.bf16 %v1638_v16, %v1638_v16 }
  0xa7   : > { %v787_v17 = vadd.f32 %v786_v14, %v785_v5  ;;  %751 = vst.msk [vmem:[%s1607_s9 + $0x84] sm:$0xf] %vm717_vm1, %v686_v49 }
  0xa8   : > { %720 = vst.msk [vmem:[%s1607_s9 + $0x8] sm:$0xf] %vm717_vm1, %v655_v13  ;;  %v983_v19 = vsel %vm782_vm2, %v918_v15, 0.0 }
  0xa9   : > { %v984_v20 = vadd.f32 %v983_v19, %v982_v9  ;;  %736 = vst.msk [vmem:[%s1607_s9 + $0x48] sm:$0xf] %vm717_vm1, %v671_v18 }
  0xac   : > { %v1707_v53 = vpop.f32.mrf.mxu2 }
  0xad   : > { %v470_v23 = vpop.f32.mrf.mxu0  ;;  %v1652_v27 = vpop.f32.mrf.mxu1  ;;  %v687_v56 = vpack.c.bf16 %v1707_v53, %v1707_v53 }
  0xae   : > { %v656_v24 = vpack.c.bf16 %v470_v23, %v470_v23  ;;  %v788_v25 = vsel %vm782_vm2, %v470_v23, 0.0  ;;  %v919_v26 = vmul.f32 %v470_v23, %v470_v23  ;;  %v672_v29 = vpack.c.bf16 %v1652_v27, %v1652_v27 }
  0xaf   : > { %v789_v28 = vadd.f32 %v788_v25, %v787_v17  ;;  %752 = vst.msk [vmem:[%s1607_s9 + $0x88] sm:$0xf] %vm717_vm1, %v687_v56  ;;  %v1777_v17 = vpop.f32.mrf.mxu3 }
  0xb0   : > { %721 = vst.msk [vmem:[%s1607_s9 + $0xc] sm:$0xf] %vm717_vm1, %v656_v24  ;;  %v985_v30 = vsel %vm782_vm2, %v919_v26, 0.0  ;;  %v702_v19 = vpack.c.bf16 %v1777_v17, %v1777_v17 }
  0xb1   : > { %v986_v31 = vadd.f32 %v985_v30, %v984_v20  ;;  %737 = vst.msk [vmem:[%s1607_s9 + $0x4c] sm:$0xf] %vm717_vm1, %v672_v29 }
  0xb2   : > { %767 = vst.msk [vmem:[%s1607_s9 + $0xc4] sm:$0xf] %vm717_vm1, %v702_v19 }
  0xb4   : > { %v1727_v61 = vpop.f32.mrf.mxu2 }
  0xb5   : > { %v473_v33 = vpop.f32.mrf.mxu0  ;;  %v1666_v38 = vpop.f32.mrf.mxu1  ;;  %v688_v0 = vpack.c.bf16 %v1727_v61, %v1727_v61 }
  0xb6   : > { %v657_v35 = vpack.c.bf16 %v473_v33, %v473_v33  ;;  %v790_v36 = vsel %vm782_vm2, %v473_v33, 0.0  ;;  %v920_v37 = vmul.f32 %v473_v33, %v473_v33  ;;  %v673_v41 = vpack.c.bf16 %v1666_v38, %v1666_v38 }
  0xb7   : > { %v1670_v40 = vadd.f32 %v790_v36, %v789_v28  ;;  %753 = vst.msk [vmem:[%s1607_s9 + $0x8c] sm:$0xf] %vm717_vm1, %v688_v0  ;;  %v1801_v25 = vpop.f32.mrf.mxu3 }
  0xb8   : > { %722 = vst.msk [vmem:[%s1607_s9 + $0x10] sm:$0xf] %vm717_vm1, %v657_v35  ;;  %v987_v42 = vsel %vm782_vm2, %v920_v37, 0.0  ;;  %v703_v28 = vpack.c.bf16 %v1801_v25, %v1801_v25 }
  0xb9   : > { %v1677_v43 = vadd.f32 %v987_v42, %v986_v31  ;;  %738 = vst.msk [vmem:[%s1607_s9 + $0x50] sm:$0xf] %vm717_vm1, %v673_v41 }
  0xba   : > { %768 = vst.msk [vmem:[%s1607_s9 + $0xc8] sm:$0xf] %vm717_vm1, %v703_v28 }
  0xbc   : > { %v1745_v3 = vpop.f32.mrf.mxu2 }
  0xbd   : > { %v1685_v45 = vpop.f32.mrf.mxu0  ;;  %v1691_v48 = vpop.f32.mrf.mxu1  ;;  %v689_v7 = vpack.c.bf16 %v1745_v3, %v1745_v3 }
  0xbe   : > { %v658_v47 = vpack.c.bf16 %v1685_v45, %v1685_v45  ;;  %v674_v50 = vpack.c.bf16 %v1691_v48, %v1691_v48  ;;  %v921_v42 = vmul.f32 %v1685_v45, %v1685_v45 }
  0xbf   : > { %754 = vst.msk [vmem:[%s1607_s9 + $0x90] sm:$0xf] %vm717_vm1, %v689_v7  ;;  %v1825_v35 = vpop.f32.mrf.mxu3 }
  0xc0   : > { %723 = vst.msk [vmem:[%s1607_s9 + $0x14] sm:$0xf] %vm717_vm1, %v658_v47  ;;  %v704_v37 = vpack.c.bf16 %v1825_v35, %v1825_v35 }
  0xc1   : > { %739 = vst.msk [vmem:[%s1607_s9 + $0x54] sm:$0xf] %vm717_vm1, %v674_v50 }
  0xc2   : > { %769 = vst.msk [vmem:[%s1607_s9 + $0xcc] sm:$0xf] %vm717_vm1, %v704_v37 }
  0xc4   : > { %v1769_v12 = vpop.f32.mrf.mxu2 }
  0xc5   : > { %v1705_v52 = vpop.f32.mrf.mxu0  ;;  %v1711_v55 = vpop.f32.mrf.mxu1  ;;  %v690_v15 = vpack.c.bf16 %v1769_v12, %v1769_v12 }
  0xc6   : > { %v659_v54 = vpack.c.bf16 %v1705_v52, %v1705_v52  ;;  %v675_v57 = vpack.c.bf16 %v1711_v55, %v1711_v55  ;;  %v922_v56 = vmul.f32 %v1705_v52, %v1705_v52  ;;  %v794_v0 = vsel %vm782_vm2, %v1705_v52, 0.0 }
  0xc7   : > { %755 = vst.msk [vmem:[%s1607_s9 + $0x94] sm:$0xf] %vm717_vm1, %v690_v15  ;;  %v1847_v50 = vpop.f32.mrf.mxu3 }
  0xc8   : > { %724 = vst.msk [vmem:[%s1607_s9 + $0x18] sm:$0xf] %vm717_vm1, %v659_v54  ;;  %v792_v54 = vsel %vm782_vm2, %v1685_v45, 0.0 }
  0xc9   : > { %740 = vst.msk [vmem:[%s1607_s9 + $0x58] sm:$0xf] %vm717_vm1, %v675_v57  ;;  %v705_v57 = vpack.c.bf16 %v1847_v50, %v1847_v50  ;;  %v793_v45 = vadd.f32 %v792_v54, %v1670_v40 }
  0xcb   : > { %770 = vst.msk [vmem:[%s1607_s9 + $0xd0] sm:$0xf] %vm717_vm1, %v705_v57  ;;  %v795_v10 = vadd.f32 %v794_v0, %v793_v45 }
  0xcc   : > { %v1793_v21 = vpop.f32.mrf.mxu2 }
  0xcd   : > { %v1725_v60 = vpop.f32.mrf.mxu0  ;;  %v1731_v63 = vpop.f32.mrf.mxu1  ;;  %v691_v24 = vpack.c.bf16 %v1793_v21, %v1793_v21 }
  0xce   : > { %v660_v62 = vpack.c.bf16 %v1725_v60, %v1725_v60  ;;  %v676_v1 = vpack.c.bf16 %v1731_v63, %v1731_v63  ;;  %v923_v59 = vmul.f32 %v1725_v60, %v1725_v60 }
  0xcf   : > { %756 = vst.msk [vmem:[%s1607_s9 + $0x98] sm:$0xf] %vm717_vm1, %v691_v24 }
  0xd0   : > { %725 = vst.msk [vmem:[%s1607_s9 + $0x1c] sm:$0xf] %vm717_vm1, %v660_v62  ;;  %v989_v62 = vsel %vm782_vm2, %v921_v42, 0.0  ;;  %v993_v52 = vsel %vm782_vm2, %v923_v59, 0.0 }
  0xd1   : > { %741 = vst.msk [vmem:[%s1607_s9 + $0x5c] sm:$0xf] %vm717_vm1, %v676_v1  ;;  %v991_v1 = vsel %vm782_vm2, %v922_v56, 0.0 }
  0xd4   : > { %v1817_v30 = vpop.f32.mrf.mxu2 }
  0xd5   : > { %v1743_v2 = vpop.f32.mrf.mxu0  ;;  %v1749_v6 = vpop.f32.mrf.mxu1  ;;  %v692_v33 = vpack.c.bf16 %v1817_v30, %v1817_v30 }
  0xd6   : > { %v661_v5 = vpack.c.bf16 %v1743_v2, %v1743_v2  ;;  %v677_v9 = vpack.c.bf16 %v1749_v6, %v1749_v6  ;;  %v924_v7 = vmul.f32 %v1743_v2, %v1743_v2  ;;  %v798_v40 = vsel %vm782_vm2, %v1743_v2, 0.0 }
  0xd7   : > { %757 = vst.msk [vmem:[%s1607_s9 + $0x9c] sm:$0xf] %vm717_vm1, %v692_v33 }
  0xd8   : > { %726 = vst.msk [vmem:[%s1607_s9 + $0x20] sm:$0xf] %vm717_vm1, %v661_v5  ;;  %v796_v5 = vsel %vm782_vm2, %v1725_v60, 0.0  ;;  %v995_v2 = vsel %vm782_vm2, %v924_v7, 0.0 }
  0xd9   : > { %742 = vst.msk [vmem:[%s1607_s9 + $0x60] sm:$0xf] %vm717_vm1, %v677_v9  ;;  %v990_v9 = vadd.f32 %v989_v62, %v1677_v43 }
  0xdb   : > { %v992_v24 = vadd.f32 %v991_v1, %v990_v9 }
  0xdc   : > { %v1839_v41 = vpop.f32.mrf.mxu2 }
  0xdd   : > { %v1767_v11 = vpop.f32.mrf.mxu0  ;;  %v1773_v14 = vpop.f32.mrf.mxu1  ;;  %v693_v49 = vpack.c.bf16 %v1839_v41, %v1839_v41  ;;  %v994_v37 = vadd.f32 %v993_v52, %v992_v24 }
  0xde   : > { %v662_v13 = vpack.c.bf16 %v1767_v11, %v1767_v11  ;;  %v678_v18 = vpack.c.bf16 %v1773_v14, %v1773_v14 }
  0xdf   : > { %758 = vst.msk [vmem:[%s1607_s9 + $0xa0] sm:$0xf] %vm717_vm1, %v693_v49 }
  0xe0   : > { %727 = vst.msk [vmem:[%s1607_s9 + $0x24] sm:$0xf] %vm717_vm1, %v662_v13 }
  0xe1   : > { %743 = vst.msk [vmem:[%s1607_s9 + $0x64] sm:$0xf] %vm717_vm1, %v678_v18  ;;  %v925_v18 = vmul.f32 %v1767_v11, %v1767_v11 }
  0xe3   : > { %v997_v49 = vsel %vm782_vm2, %v925_v18, 0.0 }
  0xe4   : > { %v1878_v15 = vpop.f32.mrf.mxu2 }
  0xe5   : > { %v1791_v20 = vpop.f32.mrf.mxu0  ;;  %v1797_v23 = vpop.f32.mrf.mxu1  ;;  %v694_v43 = vpack.c.bf16 %v1878_v15, %v1878_v15 }
  0xe6   : > { %v663_v22 = vpack.c.bf16 %v1791_v20, %v1791_v20  ;;  %v679_v26 = vpack.c.bf16 %v1797_v23, %v1797_v23  ;;  %v926_v33 = vmul.f32 %v1791_v20, %v1791_v20 }
  0xe7   : > { %759 = vst.msk [vmem:[%s1607_s9 + $0xa4] sm:$0xf] %vm717_vm1, %v694_v43 }
  0xe8   : > { %728 = vst.msk [vmem:[%s1607_s9 + $0x28] sm:$0xf] %vm717_vm1, %v663_v22  ;;  %v1888_v22 = vpop.f32.mrf.mxu3  ;;  %v999_v56 = vsel %vm782_vm2, %v926_v33, 0.0 }
  0xe9   : > { %744 = vst.msk [vmem:[%s1607_s9 + $0x68] sm:$0xf] %vm717_vm1, %v679_v26  ;;  %v797_v26 = vadd.f32 %v796_v5, %v795_v10 }
  0xeb   : > { %v799_v42 = vadd.f32 %v798_v40, %v797_v26 }
  0xec   : > { %v1916_v5 = vpop.f32.mrf.mxu2 }
  0xed   : > { %v1815_v29 = vpop.f32.mrf.mxu0  ;;  %v1821_v32 = vpop.f32.mrf.mxu1 }
  0xee   : > { %v664_v31 = vpack.c.bf16 %v1815_v29, %v1815_v29  ;;  %v680_v36 = vpack.c.bf16 %v1821_v32, %v1821_v32  ;;  %v804_v57 = vsel %vm782_vm2, %v1815_v29, 0.0 }
  0xf0   : > { %729 = vst.msk [vmem:[%s1607_s9 + $0x2c] sm:$0xf] %vm717_vm1, %v664_v31  ;;  %v800_v31 = vsel %vm782_vm2, %v1767_v11, 0.0  ;;  %v802_v11 = vsel %vm782_vm2, %v1791_v20, 0.0  ;;  %v1923_v52 = vpop.f32.mrf.mxu3 }
  0xf1   : > { %745 = vst.msk [vmem:[%s1607_s9 + $0x6c] sm:$0xf] %vm717_vm1, %v680_v36  ;;  %v706_v36 = vpack.c.bf16 %v1888_v22, %v1888_v22  ;;  %v801_v54 = vadd.f32 %v800_v31, %v799_v42  ;;  %v707_v26 = vpack.c.bf16 %v1923_v52, %v1923_v52  ;;  %v932_v42 = vmul.f32 %v1609_v58, %v1609_v58 }
  0xf3   : > { %771 = vst.msk [vmem:[%s1607_s9 + $0xd4] sm:$0xf] %vm717_vm1, %v706_v36  ;;  %v803_v0 = vadd.f32 %v802_v11, %v801_v54 }
  0xf4   : > { %772 = vst.msk [vmem:[%s1607_s9 + $0xd8] sm:$0xf] %vm717_vm1, %v707_v26 }
  0xf5   : > { %v497_v39 = vpop.f32.mrf.mxu0  ;;  %v1843_v47 = vpop.f32.mrf.mxu1  ;;  %v805_v18 = vadd.f32 %v804_v57, %v803_v0 }
  0xf6   : > { %v665_v44 = vpack.c.bf16 %v497_v39, %v497_v39  ;;  %v681_v51 = vpack.c.bf16 %v1843_v47, %v1843_v47  ;;  %v928_v59 = vmul.f32 %v497_v39, %v497_v39  ;;  %v806_v20 = vsel %vm782_vm2, %v497_v39, 0.0 }
  0xf8   : > { %730 = vst.msk [vmem:[%s1607_s9 + $0x30] sm:$0xf] %vm717_vm1, %v665_v44  ;;  %v927_v44 = vmul.f32 %v1815_v29, %v1815_v29  ;;  %v695_v29 = vpack.c.bf16 %v1916_v5, %v1916_v5  ;;  %v1003_v43 = vsel %vm782_vm2, %v928_v59, 0.0  ;;  %v1951_v0 = vpop.f32.mrf.mxu3 }
  0xf9   : > { %746 = vst.msk [vmem:[%s1607_s9 + $0x70] sm:$0xf] %vm717_vm1, %v681_v51  ;;  %v996_v51 = vadd.f32 %v995_v2, %v994_v37  ;;  %v807_v2 = vadd.f32 %v806_v20, %v805_v18 }
  0xfa   : > { %v1001_v45 = vsel %vm782_vm2, %v927_v44, 0.0  ;;  %760 = vst.msk [vmem:[%s1607_s9 + $0xa8] sm:$0xf] %vm717_vm1, %v695_v29 }
  0xfb   : > { %v998_v62 = vadd.f32 %v997_v49, %v996_v51  ;;  %v1944_v51 = vpop.f32.mrf.mxu2 }
  0xfd   : > { %v500_v13 = vpop.f32.mrf.mxu0  ;;  %v1884_v19 = vpop.f32.mrf.mxu1  ;;  %v1000_v40 = vadd.f32 %v999_v56, %v998_v62  ;;  %v696_v62 = vpack.c.bf16 %v1944_v51, %v1944_v51 }
  0xfe   : > { %v666_v60 = vpack.c.bf16 %v500_v13, %v500_v13  ;;  %v682_v28 = vpack.c.bf16 %v1884_v19, %v1884_v19  ;;  %v929_v7 = vmul.f32 %v500_v13, %v500_v13  ;;  %v808_v39 = vsel %vm782_vm2, %v500_v13, 0.0 }
  0xff   : > { %v809_v37 = vadd.f32 %v808_v39, %v807_v2  ;;  %v816_v39 = vsel %vm782_vm2, %v1623_v4, 0.0  ;;  %761 = vst.msk [vmem:[%s1607_s9 + $0xac] sm:$0xf] %vm717_vm1, %v696_v62  ;;  %v818_v2 = vsel %vm782_vm2, %v1638_v16, 0.0 }
 0x100   : > { %731 = vst.msk [vmem:[%s1607_s9 + $0x34] sm:$0xf] %vm717_vm1, %v666_v60  ;;  %v1005_v31 = vsel %vm782_vm2, %v929_v7, 0.0  ;;  %v814_v7 = vsel %vm782_vm2, %v1609_v58, 0.0  ;;  %v934_v58 = vmul.f32 %v1638_v16, %v1638_v16 }
 0x101   : > { %747 = vst.msk [vmem:[%s1607_s9 + $0x74] sm:$0xf] %vm717_vm1, %v682_v28  ;;  %v1002_v28 = vadd.f32 %v1001_v45, %v1000_v40  ;;  %v708_v40 = vpack.c.bf16 %v1951_v0, %v1951_v0 }
 0x103   : > { %v1004_v36 = vadd.f32 %v1003_v43, %v1002_v28  ;;  %v1011_v43 = vsel %vm782_vm2, %v932_v42, 0.0  ;;  %773 = vst.msk [vmem:[%s1607_s9 + $0xdc] sm:$0xf] %vm717_vm1, %v708_v40  ;;  %v936_v42 = vmul.f32 %v1666_v38, %v1666_v38  ;;  %v826_v40 = vsel %vm782_vm2, %v1711_v55, 0.0 }
 0x105   : > { %v503_v1 = vpop.f32.mrf.mxu0  ;;  %v1919_v10 = vpop.f32.mrf.mxu1  ;;  %v1006_v44 = vadd.f32 %v1005_v31, %v1004_v36  ;;  %v935_v31 = vmul.f32 %v1652_v27, %v1652_v27 }
 0x106   : > { %v667_v9 = vpack.c.bf16 %v503_v1, %v503_v1  ;;  %v683_v60 = vpack.c.bf16 %v1919_v10, %v1919_v10  ;;  %v930_v24 = vmul.f32 %v503_v1, %v503_v1  ;;  %v810_v33 = vsel %vm782_vm2, %v503_v1, 0.0  ;;  %v1980_v36 = vpop.f32.mrf.mxu2 }
 0x107   : > { %v811_v49 = vadd.f32 %v810_v33, %v809_v37  ;;  %v1015_v37 = vsel %vm782_vm2, %v934_v58, 0.0  ;;  %v697_v16 = vpack.c.bf16 %v1980_v36, %v1980_v36  ;;  %v828_v58 = vsel %vm782_vm2, %v1731_v63, 0.0 }
 0x108   : > { %732 = vst.msk [vmem:[%s1607_s9 + $0x38] sm:$0xf] %vm717_vm1, %v667_v9  ;;  %v1007_v13 = vsel %vm782_vm2, %v930_v24, 0.0  ;;  %v933_v9 = vmul.f32 %v1623_v4, %v1623_v4 }
 0x109   : > { %748 = vst.msk [vmem:[%s1607_s9 + $0x78] sm:$0xf] %vm717_vm1, %v683_v60  ;;  %v1008_v45 = vadd.f32 %v1007_v13, %v1006_v44  ;;  %v820_v13 = vsel %vm782_vm2, %v1652_v27, 0.0  ;;  %v1989_v44 = vpop.f32.mrf.mxu3  ;;  %v937_v27 = vmul.f32 %v1691_v48, %v1691_v48 }
 0x10a   : > { %v1013_v28 = vsel %vm782_vm2, %v933_v9, 0.0  ;;  %762 = vst.msk [vmem:[%s1607_s9 + $0xb0] sm:$0xf] %vm717_vm1, %v697_v16  ;;  %v832_v16 = vsel %vm782_vm2, %v1773_v14, 0.0 }
 0x10d   : > { %v506_v11 = vpop.f32.mrf.mxu0  ;;  %v1947_v59 = vpop.f32.mrf.mxu1 }
 0x10e   : > { %v668_v54 = vpack.c.bf16 %v506_v11, %v506_v11  ;;  %v812_v56 = vsel %vm782_vm2, %v506_v11, 0.0  ;;  %v931_v57 = vmul.f32 %v506_v11, %v506_v11  ;;  %v684_v20 = vpack.c.bf16 %v1947_v59, %v1947_v59 }
 0x10f   : > { %v813_v1 = vadd.f32 %v812_v56, %v811_v49  ;;  %v1017_v56 = vsel %vm782_vm2, %v935_v31, 0.0 }
 0x110   : > { %733 = vst.msk [vmem:[%s1607_s9 + $0x3c] sm:$0xf] %vm717_vm1, %v668_v54  ;;  %v1009_v29 = vsel %vm782_vm2, %v931_v57, 0.0  ;;  %v709_v54 = vpack.c.bf16 %v1989_v44, %v1989_v44  ;;  %v822_v57 = vsel %vm782_vm2, %v1666_v38, 0.0  ;;  %v1021_v38 = vsel %vm782_vm2, %v937_v27, 0.0 }
 0x111   : > { %v815_v18 = vadd.f32 %v814_v7, %v813_v1  ;;  %v1010_v60 = vadd.f32 %v1009_v29, %v1008_v45  ;;  %749 = vst.msk [vmem:[%s1607_s9 + $0x7c] sm:$0xf] %vm717_vm1, %v684_v20  ;;  %v1019_v1 = vsel %vm782_vm2, %v936_v42, 0.0  ;;  %v824_v20 = vsel %vm782_vm2, %v1691_v48, 0.0 }
 0x112   : > { %774 = vst.msk [vmem:[%s1607_s9 + $0xe0] sm:$0xf] %vm717_vm1, %v709_v54  ;;  %v938_v7 = vmul.f32 %v1711_v55, %v1711_v55 }
 0x113   : > { %v817_v24 = vadd.f32 %v816_v39, %v815_v18  ;;  %v1012_v26 = vadd.f32 %v1011_v43, %v1010_v60  ;;  %v939_v18 = vmul.f32 %v1731_v63, %v1731_v63  ;;  %v2012_v39 = vpop.f32.mrf.mxu2  ;;  %v941_v63 = vmul.f32 %v1773_v14, %v1773_v14 }
 0x114   : > { %v1023_v48 = vsel %vm782_vm2, %v938_v7, 0.0  ;;  %v698_v55 = vpack.c.bf16 %v2012_v39, %v2012_v39 }
 0x115   : > { %v819_v33 = vadd.f32 %v818_v2, %v817_v24  ;;  %v1014_v4 = vadd.f32 %v1013_v28, %v1012_v26  ;;  %v940_v24 = vmul.f32 %v1749_v6, %v1749_v6  ;;  %v2021_v26 = vpop.f32.mrf.mxu3 }
 0x116   : > { %v710_v31 = vpack.c.bf16 %v2021_v26, %v2021_v26  ;;  %763 = vst.msk [vmem:[%s1607_s9 + $0xb4] sm:$0xf] %vm717_vm1, %v698_v55 }
 0x117   : > { %v821_v49 = vadd.f32 %v820_v13, %v819_v33  ;;  %v1016_v11 = vadd.f32 %v1015_v37, %v1014_v4  ;;  %v1025_v33 = vsel %vm782_vm2, %v939_v18, 0.0  ;;  %v830_v4 = vsel %vm782_vm2, %v1749_v6, 0.0 }
 0x118   : > { %775 = vst.msk [vmem:[%s1607_s9 + $0xe4] sm:$0xf] %vm717_vm1, %v710_v31  ;;  %v1027_v42 = vsel %vm782_vm2, %v940_v24, 0.0  ;;  %v1029_v6 = vsel %vm782_vm2, %v941_v63, 0.0  ;;  %v838_v18 = vsel %vm782_vm2, %v1843_v47, 0.0  ;;  %v946_v24 = vmul.f32 %v1919_v10, %v1919_v10 }
 0x119   : > { %v823_v62 = vadd.f32 %v822_v57, %v821_v49  ;;  %v1018_v45 = vadd.f32 %v1017_v56, %v1016_v11  ;;  %v942_v49 = vmul.f32 %v1797_v23, %v1797_v23  ;;  %v834_v56 = vsel %vm782_vm2, %v1797_v23, 0.0 }
 0x11a   : > { %v943_v57 = vmul.f32 %v1821_v32, %v1821_v32  ;;  %v842_v31 = vsel %vm782_vm2, %v1919_v10, 0.0 }
 0x11b   : > { %v825_v9 = vadd.f32 %v824_v20, %v823_v62  ;;  %v1020_v29 = vadd.f32 %v1019_v1, %v1018_v45  ;;  %v2044_v45 = vpop.f32.mrf.mxu2  ;;  %v1031_v14 = vsel %vm782_vm2, %v942_v49, 0.0  ;;  %v836_v1 = vsel %vm782_vm2, %v1821_v32, 0.0 }
 0x11c   : > { %v944_v20 = vmul.f32 %v1843_v47, %v1843_v47  ;;  %v699_v23 = vpack.c.bf16 %v2044_v45, %v2044_v45  ;;  %v945_v32 = vmul.f32 %v1884_v19, %v1884_v19  ;;  %v947_v47 = vmul.f32 %v1947_v59, %v1947_v59 }
 0x11d   : > { %v1022_v60 = vadd.f32 %v1021_v38, %v1020_v29  ;;  %v827_v43 = vadd.f32 %v826_v40, %v825_v9  ;;  %v2053_v7 = vpop.f32.mrf.mxu3  ;;  %v1033_v40 = vsel %vm782_vm2, %v943_v57, 0.0 }
 0x11e   : > { %v711_v38 = vpack.c.bf16 %v2053_v7, %v2053_v7  ;;  %764 = vst.msk [vmem:[%s1607_s9 + $0xb8] sm:$0xf] %vm717_vm1, %v699_v23  ;;  %v850_v23 = vsel %vm782_vm2, %v1707_v53, 0.0 }
 0x11f   : > { %v829_v28 = vadd.f32 %v828_v58, %v827_v43  ;;  %v1024_v2 = vadd.f32 %v1023_v48, %v1022_v60  ;;  %v1035_v48 = vsel %vm782_vm2, %v944_v20, 0.0  ;;  %v840_v58 = vsel %vm782_vm2, %v1884_v19, 0.0 }
 0x120   : > { %776 = vst.msk [vmem:[%s1607_s9 + $0xe8] sm:$0xf] %vm717_vm1, %v711_v38 }
 0x121   : > { %v831_v37 = vadd.f32 %v830_v4, %v829_v28  ;;  %v1026_v13 = vadd.f32 %v1025_v33, %v1024_v2  ;;  %v1037_v2 = vsel %vm782_vm2, %v945_v32, 0.0  ;;  %v844_v33 = vsel %vm782_vm2, %v1947_v59, 0.0 }
 0x123   : > { %v833_v11 = vadd.f32 %v832_v16, %v831_v37  ;;  %v1028_v54 = vadd.f32 %v1027_v42, %v1026_v13  ;;  %v2078_v63 = vpop.f32.mrf.mxu2  ;;  %v948_v37 = vmul.f32 %v1663_v34, %v1663_v34  ;;  %v1039_v13 = vsel %vm782_vm2, %v946_v24, 0.0 }
 0x124   : > { %v1041_v42 = vsel %vm782_vm2, %v947_v47, 0.0  ;;  %v700_v16 = vpack.c.bf16 %v2078_v63, %v2078_v63  ;;  %v953_v24 = vmul.f32 %v1769_v12, %v1769_v12 }
 0x125   : > { %v835_v27 = vadd.f32 %v834_v56, %v833_v11  ;;  %v1030_v62 = vadd.f32 %v1029_v6, %v1028_v54  ;;  %v2086_v49 = vpop.f32.mrf.mxu3  ;;  %v846_v54 = vsel %vm782_vm2, %v1663_v34, 0.0  ;;  %v949_v6 = vmul.f32 %v1687_v46, %v1687_v46 }
 0x126   : > { %v712_v59 = vpack.c.bf16 %v2086_v49, %v2086_v49  ;;  %765 = vst.msk [vmem:[%s1607_s9 + $0xbc] sm:$0xf] %vm717_vm1, %v700_v16  ;;  %v956_v16 = vmul.f32 %v1839_v41, %v1839_v41 }
 0x127   : > { %v837_v9 = vadd.f32 %v836_v1, %v835_v27  ;;  %v1032_v29 = vadd.f32 %v1031_v14, %v1030_v62  ;;  %v1043_v27 = vsel %vm782_vm2, %v948_v37, 0.0  ;;  %v848_v62 = vsel %vm782_vm2, %v1687_v46, 0.0 }
 0x128   : > { %777 = vst.msk [vmem:[%s1607_s9 + $0xec] sm:$0xf] %vm717_vm1, %v712_v59  ;;  %v950_v14 = vmul.f32 %v1707_v53, %v1707_v53  ;;  %v1045_v34 = vsel %vm782_vm2, %v949_v6, 0.0  ;;  %v852_v46 = vsel %vm782_vm2, %v1727_v61, 0.0  ;;  %v862_v6 = vsel %vm782_vm2, %v1839_v41, 0.0 }
 0x129   : > { %v1034_v60 = vadd.f32 %v1033_v40, %v1032_v29  ;;  %v839_v43 = vadd.f32 %v838_v18, %v837_v9  ;;  %v951_v9 = vmul.f32 %v1727_v61, %v1727_v61  ;;  %v952_v18 = vmul.f32 %v1745_v3, %v1745_v3 }
 0x12a   : > { %v1047_v40 = vsel %vm782_vm2, %v950_v14, 0.0  ;;  %v958_v14 = vmul.f32 %v1916_v5, %v1916_v5  ;;  %v866_v41 = vsel %vm782_vm2, %v1916_v5, 0.0 }
 0x12b   : > { %v1036_v55 = vadd.f32 %v1035_v48, %v1034_v60  ;;  %v841_v28 = vadd.f32 %v840_v58, %v839_v43  ;;  %v1049_v48 = vsel %vm782_vm2, %v951_v9, 0.0  ;;  %v854_v58 = vsel %vm782_vm2, %v1745_v3, 0.0 }
 0x12c   : > { %v858_v3 = vsel %vm782_vm2, %v1793_v21, 0.0 }
 0x12d   : > { %v1038_v4 = vadd.f32 %v1037_v2, %v1036_v55  ;;  %v843_v19 = vadd.f32 %v842_v31, %v841_v28  ;;  %v2113_v32 = vpop.f32.mrf.mxu3  ;;  %v1051_v55 = vsel %vm782_vm2, %v952_v18, 0.0  ;;  %v856_v28 = vsel %vm782_vm2, %v1769_v12, 0.0 }
 0x12e   : > { %v713_v53 = vpack.c.bf16 %v2113_v32, %v2113_v32  ;;  %v954_v2 = vmul.f32 %v1793_v21, %v1793_v21  ;;  %v860_v12 = vsel %vm782_vm2, %v1817_v30, 0.0 }
 0x12f   : > { %v1040_v10 = vadd.f32 %v1039_v13, %v1038_v4  ;;  %v845_v11 = vadd.f32 %v844_v33, %v843_v19  ;;  %v1053_v4 = vsel %vm782_vm2, %v953_v24, 0.0  ;;  %v955_v19 = vmul.f32 %v1817_v30, %v1817_v30 }
 0x130   : > { %778 = vst.msk [vmem:[%s1607_s9 + $0xf0] sm:$0xf] %vm717_vm1, %v713_v53  ;;  %v870_v53 = vsel %vm782_vm2, %v1980_v36, 0.0 }
 0x131   : > { %v847_v56 = vadd.f32 %v846_v54, %v845_v11  ;;  %v1042_v57 = vadd.f32 %v1041_v42, %v1040_v10  ;;  %v1055_v42 = vsel %vm782_vm2, %v954_v2, 0.0  ;;  %v1057_v54 = vsel %vm782_vm2, %v955_v19, 0.0 }
 0x133   : > { %v849_v1 = vadd.f32 %v848_v62, %v847_v56  ;;  %v1044_v20 = vadd.f32 %v1043_v27, %v1042_v57  ;;  %v957_v56 = vmul.f32 %v1878_v15, %v1878_v15  ;;  %v1059_v27 = vsel %vm782_vm2, %v956_v16, 0.0 }
 0x134   : > { %v864_v62 = vsel %vm782_vm2, %v1878_v15, 0.0  ;;  %v868_v15 = vsel %vm782_vm2, %v1944_v51, 0.0 }
 0x135   : > { %v851_v29 = vadd.f32 %v850_v23, %v849_v1  ;;  %v1046_v38 = vadd.f32 %v1045_v34, %v1044_v20  ;;  %v2139_v10 = vpop.f32.mrf.mxu3  ;;  %v1061_v34 = vsel %vm782_vm2, %v957_v56, 0.0  ;;  %v959_v23 = vmul.f32 %v1944_v51, %v1944_v51 }
 0x136   : > { %v714_v21 = vpack.c.bf16 %v2139_v10, %v2139_v10 }
 0x137   : > { %v853_v60 = vadd.f32 %v852_v46, %v851_v29  ;;  %v1048_v43 = vadd.f32 %v1047_v40, %v1046_v38  ;;  %v1063_v38 = vsel %vm782_vm2, %v958_v14, 0.0  ;;  %v960_v40 = vmul.f32 %v1980_v36, %v1980_v36 }
 0x138   : > { %779 = vst.msk [vmem:[%s1607_s9 + $0xf4] sm:$0xf] %vm717_vm1, %v714_v21 }
 0x139   : > { %v855_v47 = vadd.f32 %v854_v58, %v853_v60  ;;  %v1050_v61 = vadd.f32 %v1049_v48, %v1048_v43  ;;  %v1065_v43 = vsel %vm782_vm2, %v959_v23, 0.0  ;;  %v961_v48 = vmul.f32 %v2012_v39, %v2012_v39 }
 0x13a   : > { %v1067_v24 = vsel %vm782_vm2, %v960_v40, 0.0  ;;  %v970_v40 = vmul.f32 %v1923_v52, %v1923_v52 }
 0x13b   : > { %v857_v31 = vadd.f32 %v856_v28, %v855_v47  ;;  %v1052_v33 = vadd.f32 %v1051_v55, %v1050_v61  ;;  %v872_v47 = vsel %vm782_vm2, %v2012_v39, 0.0  ;;  %v962_v61 = vmul.f32 %v2044_v45, %v2044_v45 }
 0x13c   : > { %v963_v55 = vmul.f32 %v2078_v63, %v2078_v63  ;;  %v1069_v2 = vsel %vm782_vm2, %v961_v48, 0.0  ;;  %v964_v39 = vmul.f32 %v1753_v8, %v1753_v8 }
 0x13d   : > { %v1054_v37 = vadd.f32 %v1053_v4, %v1052_v33  ;;  %v859_v13 = vadd.f32 %v858_v3, %v857_v31  ;;  %v2165_v46 = vpop.f32.mrf.mxu3  ;;  %v874_v31 = vsel %vm782_vm2, %v2044_v45, 0.0  ;;  %v876_v33 = vsel %vm782_vm2, %v2078_v63, 0.0 }
 0x13e   : > { %v715_v5 = vpack.c.bf16 %v2165_v46, %v2165_v46  ;;  %v1071_v19 = vsel %vm782_vm2, %v962_v61, 0.0  ;;  %v878_v45 = vsel %vm782_vm2, %v1753_v8, 0.0  ;;  %v965_v63 = vmul.f32 %v1777_v17, %v1777_v17 }
 0x13f   : > { %v861_v11 = vadd.f32 %v860_v12, %v859_v13  ;;  %v1056_v59 = vadd.f32 %v1055_v42, %v1054_v37  ;;  %v1073_v37 = vsel %vm782_vm2, %v963_v55, 0.0  ;;  %v1075_v21 = vsel %vm782_vm2, %v964_v39, 0.0 }
 0x140   : > { %780 = vst.msk [vmem:[%s1607_s9 + $0xf8] sm:$0xf] %vm717_vm1, %v715_v5  ;;  %v882_v8 = vsel %vm782_vm2, %v1801_v25, 0.0  ;;  %v973_v55 = vmul.f32 %v2021_v26, %v2021_v26  ;;  %v975_v39 = vmul.f32 %v2086_v49, %v2086_v49 }
 0x141   : > { %v863_v57 = vadd.f32 %v862_v6, %v861_v11  ;;  %v1058_v30 = vadd.f32 %v1057_v54, %v1056_v59  ;;  %v880_v54 = vsel %vm782_vm2, %v1777_v17, 0.0  ;;  %v966_v6 = vmul.f32 %v1801_v25, %v1801_v25 }
 0x142   : > { %v884_v17 = vsel %vm782_vm2, %v1825_v35, 0.0  ;;  %v886_v25 = vsel %vm782_vm2, %v1847_v50, 0.0 }
 0x143   : > { %v865_v1 = vadd.f32 %v864_v62, %v863_v57  ;;  %v1060_v20 = vadd.f32 %v1059_v27, %v1058_v30  ;;  %v1077_v30 = vsel %vm782_vm2, %v965_v63, 0.0  ;;  %v967_v27 = vmul.f32 %v1825_v35, %v1825_v35 }
 0x144   : > { %v888_v35 = vsel %vm782_vm2, %v1888_v22, 0.0  ;;  %v1097_v63 = vsel %vm782_vm2, %v975_v39, 0.0 }
 0x145   : > { %v867_v9 = vadd.f32 %v866_v41, %v865_v1  ;;  %v1062_v29 = vadd.f32 %v1061_v34, %v1060_v20  ;;  %v2192_v13 = vpop.f32.mrf.mxu3  ;;  %v1079_v1 = vsel %vm782_vm2, %v966_v6, 0.0  ;;  %v968_v20 = vmul.f32 %v1847_v50, %v1847_v50 }
 0x146   : > { %v716_v16 = vpack.c.bf16 %v2192_v13, %v2192_v13  ;;  %v1081_v23 = vsel %vm782_vm2, %v967_v27, 0.0  ;;  %v890_v50 = vsel %vm782_vm2, %v1923_v52, 0.0  ;;  %v894_v52 = vsel %vm782_vm2, %v1989_v44, 0.0 }
 0x147   : > { %v869_v18 = vadd.f32 %v868_v15, %v867_v9  ;;  %v1064_v60 = vadd.f32 %v1063_v38, %v1062_v29  ;;  %v969_v9 = vmul.f32 %v1888_v22, %v1888_v22  ;;  %v1083_v15 = vsel %vm782_vm2, %v968_v20, 0.0 }
 0x148   : > { %781 = vst.msk [vmem:[%s1607_s9 + $0xfc] sm:$0xf] %vm717_vm1, %v716_v16  ;;  %v892_v22 = vsel %vm782_vm2, %v1951_v0, 0.0  ;;  %v978_v6 = vmul.f32 %v2165_v46, %v2165_v46  ;;  %v908_v27 = vsel %vm782_vm2, %v2192_v13, 0.0 }
 0x149   : > { %v1066_v58 = vadd.f32 %v1065_v43, %v1064_v60  ;;  %v871_v51 = vadd.f32 %v870_v53, %v869_v18  ;;  %v1085_v5 = vsel %vm782_vm2, %v969_v9, 0.0  ;;  %v971_v43 = vmul.f32 %v1951_v0, %v1951_v0 }
 0x14a   : > { %v896_v0 = vsel %vm782_vm2, %v2021_v26, 0.0  ;;  %v900_v26 = vsel %vm782_vm2, %v2086_v49, 0.0  ;;  %v904_v49 = vsel %vm782_vm2, %v2139_v10, 0.0 }
 0x14b   : > { %v1068_v28 = vadd.f32 %v1067_v24, %v1066_v58  ;;  %v873_v36 = vadd.f32 %v872_v47, %v871_v51  ;;  %v1087_v58 = vsel %vm782_vm2, %v970_v40, 0.0  ;;  %v972_v51 = vmul.f32 %v1989_v44, %v1989_v44 }
 0x14c   : > { %v1089_v61 = vsel %vm782_vm2, %v971_v43, 0.0  ;;  %v898_v44 = vsel %vm782_vm2, %v2053_v7, 0.0 }
 0x14d   : > { %v1070_v4 = vadd.f32 %v1069_v2, %v1068_v28  ;;  %v875_v3 = vadd.f32 %v874_v31, %v873_v36  ;;  %v1091_v2 = vsel %vm782_vm2, %v972_v51, 0.0  ;;  %v974_v31 = vmul.f32 %v2053_v7, %v2053_v7 }
 0x14e   : > { %v902_v7 = vsel %vm782_vm2, %v2113_v32, 0.0 }
 0x14f   : > { %v1072_v42 = vadd.f32 %v1071_v19, %v1070_v4  ;;  %v877_v12 = vadd.f32 %v876_v33, %v875_v3  ;;  %v1093_v3 = vsel %vm782_vm2, %v973_v55, 0.0 }
 0x151   : > { %v879_v11 = vadd.f32 %v878_v45, %v877_v12  ;;  %v1074_v59 = vadd.f32 %v1073_v37, %v1072_v42  ;;  %v1095_v42 = vsel %vm782_vm2, %v974_v31, 0.0  ;;  %v976_v12 = vmul.f32 %v2113_v32, %v2113_v32 }
 0x153   : > { %v881_v56 = vadd.f32 %v880_v54, %v879_v11  ;;  %v1076_v57 = vadd.f32 %v1075_v21, %v1074_v59  ;;  %v977_v11 = vmul.f32 %v2139_v10, %v2139_v10  ;;  %v1099_v54 = vsel %vm782_vm2, %v976_v12, 0.0 }
 0x155   : > { %v883_v62 = vadd.f32 %v882_v8, %v881_v56  ;;  %v1078_v14 = vadd.f32 %v1077_v30, %v1076_v57  ;;  %v979_v56 = vmul.f32 %v2192_v13, %v2192_v13  ;;  %v1101_v32 = vsel %vm782_vm2, %v977_v11, 0.0 }
 0x156   : > { %v906_v8 = vsel %vm782_vm2, %v2165_v46, 0.0 }
 0x157   : > { %v885_v34 = vadd.f32 %v884_v17, %v883_v62  ;;  %v1080_v41 = vadd.f32 %v1079_v1, %v1078_v14  ;;  %v1103_v14 = vsel %vm782_vm2, %v978_v6, 0.0  ;;  %v1105_v1 = vsel %vm782_vm2, %v979_v56, 0.0 }
 0x159   : > { %v887_v29 = vadd.f32 %v886_v25, %v885_v34  ;;  %v1082_v38 = vadd.f32 %v1081_v23, %v1080_v41 }
 0x15b   : > { %v889_v18 = vadd.f32 %v888_v35, %v887_v29  ;;  %v1084_v60 = vadd.f32 %v1083_v15, %v1082_v38 }
 0x15d   : > { %v1086_v53 = vadd.f32 %v1085_v5, %v1084_v60  ;;  %v891_v48 = vadd.f32 %v890_v50, %v889_v18 }
 0x15f   : > { %v893_v24 = vadd.f32 %v892_v22, %v891_v48  ;;  %v1088_v47 = vadd.f32 %v1087_v58, %v1086_v53 }
 0x161   : > { %v895_v28 = vadd.f32 %v894_v52, %v893_v24  ;;  %v1090_v36 = vadd.f32 %v1089_v61, %v1088_v47 }
 0x163   : > { %v897_v33 = vadd.f32 %v896_v0, %v895_v28  ;;  %v1092_v4 = vadd.f32 %v1091_v2, %v1090_v36 }
 0x165   : > { %v899_v19 = vadd.f32 %v898_v44, %v897_v33  ;;  %v1094_v37 = vadd.f32 %v1093_v3, %v1092_v4 }
 0x167   : > { %v901_v16 = vadd.f32 %v900_v26, %v899_v19  ;;  %v1096_v45 = vadd.f32 %v1095_v42, %v1094_v37 }
 0x169   : > { %v1098_v59 = vadd.f32 %v1097_v63, %v1096_v45  ;;  %v903_v21 = vadd.f32 %v902_v7, %v901_v16 }
 0x16b   : > { %v1100_v57 = vadd.f32 %v1099_v54, %v1098_v59  ;;  %v905_v30 = vadd.f32 %v904_v49, %v903_v21 }
 0x16d   : > { %v1102_v62 = vadd.f32 %v1101_v32, %v1100_v57  ;;  %v907_v10 = vadd.f32 %v906_v8, %v905_v30 }
 0x16f   : > { %v1104_v17 = vadd.f32 %v1103_v14, %v1102_v62  ;;  %v909_v20 = vadd.f32 %v908_v27, %v907_v10 }
 0x171   : > { %v910_v34 = vrot.slane %v909_v20, 4  ;;  %v1106_v41 = vadd.f32 %v1105_v1, %v1104_v17 }
 0x173   : > { %v911_v23 = vadd.f32 %v910_v34, %v909_v20  ;;  %v1107_v25 = vrot.slane %v1106_v41, 4 }
 0x175   : > { %v912_v9 = vrot.slane %v911_v23, 2  ;;  %v1108_v29 = vadd.f32 %v1107_v25, %v1106_v41 }
 0x177   : > { %v913_v46 = vadd.f32 %v912_v9, %v911_v23  ;;  %v1109_v38 = vrot.slane %v1108_v29, 2 }
 0x179   : > { %v914_v13 = vrot.slane %v913_v46, 1  ;;  %v1110_v15 = vadd.f32 %v1109_v38, %v1108_v29 }
 0x17b   : > { %v1111_v35 = vrot.slane %v1110_v15, 1  ;;  %v915_v40 = vadd.f32 %v914_v13, %v913_v46 }
 0x17d   : > { %v1112_v18 = vadd.f32 %v1111_v35, %v1110_v15 }
 0x17f   : > { %v1114_v60 = vsel %vm1113_vm3, %v915_v40, %v1112_v18 }
 0x180   : > { %1116 = vst.msk [vmem:[%s172_s25] sm:$0x3] %vm1115_vm4, %v1114_v60 }
 0x181   : > { %1375 = shalt.err (!%p1372_p3)
}
 0x182   : > { %1309 = dma.vmem_to_hbm [thread:$0]  (%p1470_p5), %s1140_s26, 32, %s1142_s27, %s1123_s16  }
 0x183 PF: > { %p1315_p4 = scmp.ge.s32.totalorder %s1410_s15, 2  ;;  %s1161_s8 = sand.u32 1, %s1398_s12  }
 0x184   : > { %s1162_s9 = scalar_lea.sflag [#allocation3], %s1161_s8 }
 0x185   : > { %p1312_p7 = pnand %p1315_p4, %p1474_p6 }
 0x187   : > { %p1313_p8 = pneg %p1312_p7 }
 0x189   : > { %1393 = dma.done.wait (%p1313_p8), %s1162_s9, 32  }
 0x18a   : > { %1395 = vsyncadd (%p1313_p8), %s1162_s9, 4294967264  ;;  %p14_p9 = scmp.ge.s32.totalorder %s1457_s18, 4   ;;  %s2314_s12 = smov %s1402_s13 }
 0x18b   : > { %s2315_s13 = smov %s1406_s14  ;;  %s2316_s14 = smov %s1468_s21 }
 0x18c   : > { %s2317_s15 = smov %s1457_s18  ;;  %16 = sbr.rel (!%p14_p9) target bundleno = 3 (0x3), region = 75 }
 0x191   :  { %1168 = vsyncpa [#allocation3], 1 }
 0x192   :  { %1170 = vsyncpa [#allocation3 + $0x1], 1 }

</bundles_post_ra>
